<compile_context>
chip_gen: v5e
topology: v5e:2x2
jax: 0.10.0
libtpu: 0.0.40
codegen_flags: <defaults>
</compile_context>

<pallas_src>
import functools

import jax
import jax.numpy as jnp
from jax.experimental import pallas as pl
from jax.experimental.pallas import tpu as pltpu


def _spp_kernel(x_ref, w1_ref, b1_ref, w2_ref, b2_ref, col_ref, row_ref,
                o_ref, *, H, W):
    """One grid step = one batch element, whole image resident in VMEM.

    x_ref:   (1, C1, H*W)  f32   input image, channels on sublane, pixels on lane
    w1_ref:  (c_, C1)      bf16  cv1 1x1 weights with BN1 scale folded in
    b1_ref:  (c_, 1)       f32   cv1 folded BN bias
    w2_ref:  (4, C2, c_)   bf16  cv2 weights split per concat source, BN2 folded
    b2_ref:  (C2, 1)       f32   cv2 folded BN bias
    col_ref: (1, H*W)      i32   column index of each flattened pixel
    row_ref: (1, H*W)      i32   row index of each flattened pixel
    o_ref:   (1, C2, H*W)  f32   output (lane-dense stores)
    """
    HW = x_ref.shape[2]
    neg = jnp.float32(-jnp.inf)

    col = col_ref[...]
    row = row_ref[...]

    # ---- cv1: 1x1 conv (BN folded) + LeakyReLU(0.1) -> one MXU dot ----------
    x = x_ref[0].astype(jnp.bfloat16)                       # (C1, HW)
    y = jnp.dot(w1_ref[...], x, preferred_element_type=jnp.float32)
    y = y + b1_ref[...]
    y = jnp.where(y > 0, y, 0.1 * y)                        # (c_, HW) f32

    # ---- 5x5 max pool, stride 1, -inf "same" padding (PyTorch semantics) ----
    # Separable (cols then rows) on the flattened layout via lane rolls + masks.
    def maxpool5(t):
        acc = t
        for d in (1, 2):                                    # look right / left
            rt = jnp.where(col < W - d, pltpu.roll(t, shift=HW - d, axis=1), neg)
            lt = jnp.where(col >= d,    pltpu.roll(t, shift=d,      axis=1), neg)
            acc = jnp.maximum(acc, jnp.maximum(lt, rt))
        t2 = acc
        acc = t2
        for d in (1, 2):                                    # look down / up
            dn = jnp.where(row < H - d,
                           pltpu.roll(t2, shift=HW - d * W, axis=1), neg)
            up = jnp.where(row >= d,
                           pltpu.roll(t2, shift=d * W, axis=1), neg)
            acc = jnp.maximum(acc, jnp.maximum(up, dn))
        return acc

    # Cascaded 5x5 pools == pools with k = 5, 9, 13 (exact identity).
    p1 = maxpool5(y)
    p2 = maxpool5(p1)
    p3 = maxpool5(p2)

    # ---- cv2: 1x1 conv over channel-concat [y, p1, p2, p3] + LeakyReLU ------
    # Sum of 4 dots (one per concat source) -> no in-VMEM sublane concat/relayout.
    def dotf(j, t):
        return jnp.dot(w2_ref[j], t.astype(jnp.bfloat16),
                       preferred_element_type=jnp.float32)

    z = dotf(0, y) + dotf(1, p1) + dotf(2, p2) + dotf(3, p3)   # (C2, HW)
    z = z + b2_ref[...]
    z = jnp.where(z > 0, z, 0.1 * z)
    o_ref[0] = z.astype(o_ref.dtype)


@jax.jit
def spp_forward(x, w1, g1, be1, m1, v1, w2, g2, be2, m2, v2, eps=1e-5):
    """SPP forward. x: (N, C1, H, W) NCHW; returns (N, C2, H, W) NCHW (f32)."""
    N, C1, H, W = x.shape
    c_ = w1.shape[0]
    C2 = w2.shape[0]
    HW = H * W

    # ---- glue (tiny, no full-tensor HBM passes): BN folding + weight split --
    s1 = g1 / jnp.sqrt(v1 + eps)
    w1f = (w1.reshape(c_, C1) * s1[:, None]).astype(jnp.bfloat16)
    b1f = (be1 - m1 * s1).astype(jnp.float32).reshape(c_, 1)

    s2 = g2 / jnp.sqrt(v2 + eps)
    w2m = w2.reshape(C2, 4 * c_) * s2[:, None]
    w2f = w2m.reshape(C2, 4, c_).transpose(1, 0, 2).astype(jnp.bfloat16)  # (4,C2,c_)
    b2f = (be2 - m2 * s2).astype(jnp.float32).reshape(C2, 1)

    # Free reshape (contiguous): channels on sublane, flattened pixels on lane.
    x_flat = x.astype(jnp.float32).reshape(N, C1, HW)

    ids = jnp.arange(HW, dtype=jnp.int32)
    col = (ids % W).reshape(1, HW)
    row = (ids // W).reshape(1, HW)

    kern = functools.partial(_spp_kernel, H=H, W=W)
    out = pl.pallas_call(
        kern,
        out_shape=jax.ShapeDtypeStruct((N, C2, HW), jnp.float32),
        grid_spec=pltpu.PrefetchScalarGridSpec(
            num_scalar_prefetch=0,
            grid=(N,),
            in_specs=[
                pl.BlockSpec((1, C1, HW), lambda n: (n, 0, 0)),
                pl.BlockSpec((c_, C1), lambda n: (0, 0)),
                pl.BlockSpec((c_, 1), lambda n: (0, 0)),
                pl.BlockSpec((4, C2, c_), lambda n: (0, 0, 0)),
                pl.BlockSpec((C2, 1), lambda n: (0, 0)),
                pl.BlockSpec((1, HW), lambda n: (0, 0)),
                pl.BlockSpec((1, HW), lambda n: (0, 0)),
            ],
            out_specs=pl.BlockSpec((1, C2, HW), lambda n: (n, 0, 0)),
        ),
        compiler_params=pltpu.CompilerParams(
            dimension_semantics=("parallel",),
        ),
    )(x_flat, w1f, b1f, w2f, b2f, col, row)

    return out.reshape(N, C2, H, W)


def _reference(x, w1, g1, be1, m1, v1, w2, g2, be2, m2, v2, eps=1e-5):
    """Pure-JAX f32 reference matching the PyTorch SPP forward (eval-mode BN)."""
    def conv_bn_act(t, w, gamma, beta, mean, var):
        y = jax.lax.conv_general_dilated(
            t.astype(jnp.float32), w.astype(jnp.float32), (1, 1), "SAME",
            dimension_numbers=("NCHW", "OIHW", "NCHW"))
        s = gamma / jnp.sqrt(var + eps)
        b = beta - mean * s
        y = y * s[None, :, None, None] + b[None, :, None, None]
        return jnp.where(y > 0, y, 0.1 * y)

    def mp(t, k):
        p = k // 2
        return jax.lax.reduce_window(
            t, -jnp.inf, jax.lax.max, (1, 1, k, k), (1, 1, 1, 1),
            [(0, 0), (0, 0), (p, p), (p, p)])

    y = conv_bn_act(x, w1, g1, be1, m1, v1)
    cat = jnp.concatenate([y, mp(y, 5), mp(y, 9), mp(y, 13)], axis=1)
    return conv_bn_act(cat, w2, g2, be2, m2, v2)


if __name__ == "__main__":
    # SPP(c1=4, c2=8), k=(5,9,13)  ->  c_ = c1//2 = 2, concat channels = 4*c_ = 8
    N, C1, H, W = 2, 4, 16, 16
    C2 = 8
    c_ = C1 // 2

    key = jax.random.PRNGKey(0)
    ks = jax.random.split(key, 11)
    x = jax.random.normal(ks[0], (N, C1, H, W), dtype=jnp.float32)

    w1 = 0.1 * jax.random.normal(ks[1], (c_, C1, 1, 1), dtype=jnp.float32)
    g1 = 1.0 + 0.1 * jax.random.normal(ks[2], (c_,), dtype=jnp.float32)
    be1 = 0.1 * jax.random.normal(ks[3], (c_,), dtype=jnp.float32)
    m1 = 0.1 * jax.random.normal(ks[4], (c_,), dtype=jnp.float32)
    v1 = jnp.abs(1.0 + 0.1 * jax.random.normal(ks[5], (c_,), dtype=jnp.float32))

    w2 = 0.1 * jax.random.normal(ks[6], (C2, 4 * c_, 1, 1), dtype=jnp.float32)
    g2 = 1.0 + 0.1 * jax.random.normal(ks[7], (C2,), dtype=jnp.float32)
    be2 = 0.1 * jax.random.normal(ks[8], (C2,), dtype=jnp.float32)
    m2 = 0.1 * jax.random.normal(ks[9], (C2,), dtype=jnp.float32)
    v2 = jnp.abs(1.0 + 0.1 * jax.random.normal(ks[10], (C2,), dtype=jnp.float32))

    out = spp_forward(x, w1, g1, be1, m1, v1, w2, g2, be2, m2, v2)
    out = jax.block_until_ready(out)

    ref = _reference(x, w1, g1, be1, m1, v1, w2, g2, be2, m2, v2)
    assert out.shape == (N, C2, H, W), out.shape
    max_err = float(jnp.max(jnp.abs(out - ref)))
    # bf16 MXU inputs (f32 accumulation) -> loosened tolerance vs pure-f32 ref.
    assert jnp.allclose(out, ref, atol=2e-2, rtol=2e-2), max_err
    print("KERNEL_OK")
</pallas_src>

<mosaic_0001>
module attributes {stable_mosaic.version = 11 : i64} {
  func.func @_spp_kernel(%arg0: i32, %arg1: memref<1x4x256xf32, #tpu.memory_space<vmem>>, %arg2: memref<2x4xbf16, #tpu.memory_space<vmem>>, %arg3: memref<2x1xf32, #tpu.memory_space<vmem>>, %arg4: memref<4x8x2xbf16, #tpu.memory_space<vmem>>, %arg5: memref<8x1xf32, #tpu.memory_space<vmem>>, %arg6: memref<1x256xi32, #tpu.memory_space<vmem>>, %arg7: memref<1x256xi32, #tpu.memory_space<vmem>>, %arg8: memref<1x8x256xf32, #tpu.memory_space<vmem>>) attributes {dimension_semantics = [#tpu.dimension_semantics<parallel>], iteration_bounds = array<i64: 2>, scalar_prefetch = 0 : i64, scratch_operands = 0 : i64, tpu.core_type = #tpu.core_type<tc>, window_params = [{transform_indices = @transform_0, window_bounds = array<i64: 1, 4, 256>}, {pipeline_mode = #tpu.pipeline_mode<synchronous>, transform_indices = @transform_1, window_bounds = array<i64: 2, 4>}, {pipeline_mode = #tpu.pipeline_mode<synchronous>, transform_indices = @transform_2, window_bounds = array<i64: 2, 1>}, {pipeline_mode = #tpu.pipeline_mode<synchronous>, transform_indices = @transform_3, window_bounds = array<i64: 4, 8, 2>}, {pipeline_mode = #tpu.pipeline_mode<synchronous>, transform_indices = @transform_4, window_bounds = array<i64: 8, 1>}, {pipeline_mode = #tpu.pipeline_mode<synchronous>, transform_indices = @transform_5, window_bounds = array<i64: 1, 256>}, {pipeline_mode = #tpu.pipeline_mode<synchronous>, transform_indices = @transform_6, window_bounds = array<i64: 1, 256>}, {transform_indices = @transform_7, window_bounds = array<i64: 1, 8, 256>}]} {
    %c0 = arith.constant 0 : index
    %c0_0 = arith.constant 0 : index
    %0 = vector.load %arg6[%c0, %c0_0] : memref<1x256xi32, #tpu.memory_space<vmem>>, vector<1x256xi32>
    %c0_1 = arith.constant 0 : index
    %c0_2 = arith.constant 0 : index
    %1 = vector.load %arg7[%c0_1, %c0_2] : memref<1x256xi32, #tpu.memory_space<vmem>>, vector<1x256xi32>
    %c0_3 = arith.constant 0 : index
    %c0_4 = arith.constant 0 : index
    %c0_5 = arith.constant 0 : index
    %2 = vector.load %arg1[%c0_3, %c0_4, %c0_5] : memref<1x4x256xf32, #tpu.memory_space<vmem>>, vector<1x4x256xf32>
    %3 = vector.shape_cast %2 : vector<1x4x256xf32> to vector<4x256xf32>
    %4 = arith.truncf %3 : vector<4x256xf32> to vector<4x256xbf16>
    %c0_6 = arith.constant 0 : index
    %c0_7 = arith.constant 0 : index
    %5 = vector.load %arg2[%c0_6, %c0_7] : memref<2x4xbf16, #tpu.memory_space<vmem>>, vector<2x4xbf16>
    %cst = arith.constant dense<0.000000e+00> : vector<2x256xf32>
    %6 = tpu.matmul %5, %4, %cst {dimension_numbers = #tpu.dot_dimension_numbers<[1], [0], [0], [1], [0, 0, 1, 1], [], []>} : vector<2x4xbf16>, vector<4x256xbf16>, vector<2x256xf32> -> vector<2x256xf32>
    %c0_8 = arith.constant 0 : index
    %c0_9 = arith.constant 0 : index
    %7 = vector.load %arg3[%c0_8, %c0_9] : memref<2x1xf32, #tpu.memory_space<vmem>>, vector<2x1xf32>
    %8 = vector.broadcast %7 : vector<2x1xf32> to vector<2x256xf32>
    %9 = arith.addf %6, %8 : vector<2x256xf32>
    %cst_10 = arith.constant 0.000000e+00 : f32
    %10 = vector.broadcast %cst_10 : f32 to vector<2x256xf32>
    %11 = arith.cmpf ogt, %9, %10 : vector<2x256xf32>
    %cst_11 = arith.constant 1.000000e-01 : f32
    %12 = vector.broadcast %cst_11 : f32 to vector<2x256xf32>
    %13 = arith.mulf %12, %9 : vector<2x256xf32>
    %14 = arith.select %11, %9, %13 : vector<2x256xi1>, vector<2x256xf32>
    %c15_i32 = arith.constant 15 : i32
    %15 = vector.broadcast %c15_i32 : i32 to vector<1x256xi32>
    %16 = arith.cmpi slt, %0, %15 : vector<1x256xi32>
    %c255_i32 = arith.constant 255 : i32
    %17 = tpu.dynamic_rotate %14 by %c255_i32 dim 1 : vector<2x256xf32>, i32 -> vector<2x256xf32>
    %cst_12 = arith.constant 0xFF800000 : f32
    %18 = vector.shape_cast %16 : vector<1x256xi1> to vector<1x256xi1>
    %19 = vector.broadcast %18 : vector<1x256xi1> to vector<2x256xi1>
    %20 = vector.broadcast %cst_12 : f32 to vector<2x256xf32>
    %21 = arith.select %19, %17, %20 : vector<2x256xi1>, vector<2x256xf32>
    %c1_i32 = arith.constant 1 : i32
    %22 = vector.broadcast %c1_i32 : i32 to vector<1x256xi32>
    %23 = arith.cmpi sge, %0, %22 : vector<1x256xi32>
    %c1_i32_13 = arith.constant 1 : i32
    %24 = tpu.dynamic_rotate %14 by %c1_i32_13 dim 1 : vector<2x256xf32>, i32 -> vector<2x256xf32>
    %cst_14 = arith.constant 0xFF800000 : f32
    %25 = vector.shape_cast %23 : vector<1x256xi1> to vector<1x256xi1>
    %26 = vector.broadcast %25 : vector<1x256xi1> to vector<2x256xi1>
    %27 = vector.broadcast %cst_14 : f32 to vector<2x256xf32>
    %28 = arith.select %26, %24, %27 : vector<2x256xi1>, vector<2x256xf32>
    %29 = arith.maximumf %28, %21 : vector<2x256xf32>
    %30 = arith.maximumf %14, %29 : vector<2x256xf32>
    %c14_i32 = arith.constant 14 : i32
    %31 = vector.broadcast %c14_i32 : i32 to vector<1x256xi32>
    %32 = arith.cmpi slt, %0, %31 : vector<1x256xi32>
    %c254_i32 = arith.constant 254 : i32
    %33 = tpu.dynamic_rotate %14 by %c254_i32 dim 1 : vector<2x256xf32>, i32 -> vector<2x256xf32>
    %cst_15 = arith.constant 0xFF800000 : f32
    %34 = vector.shape_cast %32 : vector<1x256xi1> to vector<1x256xi1>
    %35 = vector.broadcast %34 : vector<1x256xi1> to vector<2x256xi1>
    %36 = vector.broadcast %cst_15 : f32 to vector<2x256xf32>
    %37 = arith.select %35, %33, %36 : vector<2x256xi1>, vector<2x256xf32>
    %c2_i32 = arith.constant 2 : i32
    %38 = vector.broadcast %c2_i32 : i32 to vector<1x256xi32>
    %39 = arith.cmpi sge, %0, %38 : vector<1x256xi32>
    %c2_i32_16 = arith.constant 2 : i32
    %40 = tpu.dynamic_rotate %14 by %c2_i32_16 dim 1 : vector<2x256xf32>, i32 -> vector<2x256xf32>
    %cst_17 = arith.constant 0xFF800000 : f32
    %41 = vector.shape_cast %39 : vector<1x256xi1> to vector<1x256xi1>
    %42 = vector.broadcast %41 : vector<1x256xi1> to vector<2x256xi1>
    %43 = vector.broadcast %cst_17 : f32 to vector<2x256xf32>
    %44 = arith.select %42, %40, %43 : vector<2x256xi1>, vector<2x256xf32>
    %45 = arith.maximumf %44, %37 : vector<2x256xf32>
    %46 = arith.maximumf %30, %45 : vector<2x256xf32>
    %c15_i32_18 = arith.constant 15 : i32
    %47 = vector.broadcast %c15_i32_18 : i32 to vector<1x256xi32>
    %48 = arith.cmpi slt, %1, %47 : vector<1x256xi32>
    %c240_i32 = arith.constant 240 : i32
    %49 = tpu.dynamic_rotate %46 by %c240_i32 dim 1 : vector<2x256xf32>, i32 -> vector<2x256xf32>
    %cst_19 = arith.constant 0xFF800000 : f32
    %50 = vector.shape_cast %48 : vector<1x256xi1> to vector<1x256xi1>
    %51 = vector.broadcast %50 : vector<1x256xi1> to vector<2x256xi1>
    %52 = vector.broadcast %cst_19 : f32 to vector<2x256xf32>
    %53 = arith.select %51, %49, %52 : vector<2x256xi1>, vector<2x256xf32>
    %c1_i32_20 = arith.constant 1 : i32
    %54 = vector.broadcast %c1_i32_20 : i32 to vector<1x256xi32>
    %55 = arith.cmpi sge, %1, %54 : vector<1x256xi32>
    %c16_i32 = arith.constant 16 : i32
    %56 = tpu.dynamic_rotate %46 by %c16_i32 dim 1 : vector<2x256xf32>, i32 -> vector<2x256xf32>
    %cst_21 = arith.constant 0xFF800000 : f32
    %57 = vector.shape_cast %55 : vector<1x256xi1> to vector<1x256xi1>
    %58 = vector.broadcast %57 : vector<1x256xi1> to vector<2x256xi1>
    %59 = vector.broadcast %cst_21 : f32 to vector<2x256xf32>
    %60 = arith.select %58, %56, %59 : vector<2x256xi1>, vector<2x256xf32>
    %61 = arith.maximumf %60, %53 : vector<2x256xf32>
    %62 = arith.maximumf %46, %61 : vector<2x256xf32>
    %c14_i32_22 = arith.constant 14 : i32
    %63 = vector.broadcast %c14_i32_22 : i32 to vector<1x256xi32>
    %64 = arith.cmpi slt, %1, %63 : vector<1x256xi32>
    %c224_i32 = arith.constant 224 : i32
    %65 = tpu.dynamic_rotate %46 by %c224_i32 dim 1 : vector<2x256xf32>, i32 -> vector<2x256xf32>
    %cst_23 = arith.constant 0xFF800000 : f32
    %66 = vector.shape_cast %64 : vector<1x256xi1> to vector<1x256xi1>
    %67 = vector.broadcast %66 : vector<1x256xi1> to vector<2x256xi1>
    %68 = vector.broadcast %cst_23 : f32 to vector<2x256xf32>
    %69 = arith.select %67, %65, %68 : vector<2x256xi1>, vector<2x256xf32>
    %c2_i32_24 = arith.constant 2 : i32
    %70 = vector.broadcast %c2_i32_24 : i32 to vector<1x256xi32>
    %71 = arith.cmpi sge, %1, %70 : vector<1x256xi32>
    %c32_i32 = arith.constant 32 : i32
    %72 = tpu.dynamic_rotate %46 by %c32_i32 dim 1 : vector<2x256xf32>, i32 -> vector<2x256xf32>
    %cst_25 = arith.constant 0xFF800000 : f32
    %73 = vector.shape_cast %71 : vector<1x256xi1> to vector<1x256xi1>
    %74 = vector.broadcast %73 : vector<1x256xi1> to vector<2x256xi1>
    %75 = vector.broadcast %cst_25 : f32 to vector<2x256xf32>
    %76 = arith.select %74, %72, %75 : vector<2x256xi1>, vector<2x256xf32>
    %77 = arith.maximumf %76, %69 : vector<2x256xf32>
    %78 = arith.maximumf %62, %77 : vector<2x256xf32>
    %c15_i32_26 = arith.constant 15 : i32
    %79 = vector.broadcast %c15_i32_26 : i32 to vector<1x256xi32>
    %80 = arith.cmpi slt, %0, %79 : vector<1x256xi32>
    %c255_i32_27 = arith.constant 255 : i32
    %81 = tpu.dynamic_rotate %78 by %c255_i32_27 dim 1 : vector<2x256xf32>, i32 -> vector<2x256xf32>
    %cst_28 = arith.constant 0xFF800000 : f32
    %82 = vector.shape_cast %80 : vector<1x256xi1> to vector<1x256xi1>
    %83 = vector.broadcast %82 : vector<1x256xi1> to vector<2x256xi1>
    %84 = vector.broadcast %cst_28 : f32 to vector<2x256xf32>
    %85 = arith.select %83, %81, %84 : vector<2x256xi1>, vector<2x256xf32>
    %c1_i32_29 = arith.constant 1 : i32
    %86 = vector.broadcast %c1_i32_29 : i32 to vector<1x256xi32>
    %87 = arith.cmpi sge, %0, %86 : vector<1x256xi32>
    %c1_i32_30 = arith.constant 1 : i32
    %88 = tpu.dynamic_rotate %78 by %c1_i32_30 dim 1 : vector<2x256xf32>, i32 -> vector<2x256xf32>
    %cst_31 = arith.constant 0xFF800000 : f32
    %89 = vector.shape_cast %87 : vector<1x256xi1> to vector<1x256xi1>
    %90 = vector.broadcast %89 : vector<1x256xi1> to vector<2x256xi1>
    %91 = vector.broadcast %cst_31 : f32 to vector<2x256xf32>
    %92 = arith.select %90, %88, %91 : vector<2x256xi1>, vector<2x256xf32>
    %93 = arith.maximumf %92, %85 : vector<2x256xf32>
    %94 = arith.maximumf %78, %93 : vector<2x256xf32>
    %c14_i32_32 = arith.constant 14 : i32
    %95 = vector.broadcast %c14_i32_32 : i32 to vector<1x256xi32>
    %96 = arith.cmpi slt, %0, %95 : vector<1x256xi32>
    %c254_i32_33 = arith.constant 254 : i32
    %97 = tpu.dynamic_rotate %78 by %c254_i32_33 dim 1 : vector<2x256xf32>, i32 -> vector<2x256xf32>
    %cst_34 = arith.constant 0xFF800000 : f32
    %98 = vector.shape_cast %96 : vector<1x256xi1> to vector<1x256xi1>
    %99 = vector.broadcast %98 : vector<1x256xi1> to vector<2x256xi1>
    %100 = vector.broadcast %cst_34 : f32 to vector<2x256xf32>
    %101 = arith.select %99, %97, %100 : vector<2x256xi1>, vector<2x256xf32>
    %c2_i32_35 = arith.constant 2 : i32
    %102 = vector.broadcast %c2_i32_35 : i32 to vector<1x256xi32>
    %103 = arith.cmpi sge, %0, %102 : vector<1x256xi32>
    %c2_i32_36 = arith.constant 2 : i32
    %104 = tpu.dynamic_rotate %78 by %c2_i32_36 dim 1 : vector<2x256xf32>, i32 -> vector<2x256xf32>
    %cst_37 = arith.constant 0xFF800000 : f32
    %105 = vector.shape_cast %103 : vector<1x256xi1> to vector<1x256xi1>
    %106 = vector.broadcast %105 : vector<1x256xi1> to vector<2x256xi1>
    %107 = vector.broadcast %cst_37 : f32 to vector<2x256xf32>
    %108 = arith.select %106, %104, %107 : vector<2x256xi1>, vector<2x256xf32>
    %109 = arith.maximumf %108, %101 : vector<2x256xf32>
    %110 = arith.maximumf %94, %109 : vector<2x256xf32>
    %c15_i32_38 = arith.constant 15 : i32
    %111 = vector.broadcast %c15_i32_38 : i32 to vector<1x256xi32>
    %112 = arith.cmpi slt, %1, %111 : vector<1x256xi32>
    %c240_i32_39 = arith.constant 240 : i32
    %113 = tpu.dynamic_rotate %110 by %c240_i32_39 dim 1 : vector<2x256xf32>, i32 -> vector<2x256xf32>
    %cst_40 = arith.constant 0xFF800000 : f32
    %114 = vector.shape_cast %112 : vector<1x256xi1> to vector<1x256xi1>
    %115 = vector.broadcast %114 : vector<1x256xi1> to vector<2x256xi1>
    %116 = vector.broadcast %cst_40 : f32 to vector<2x256xf32>
    %117 = arith.select %115, %113, %116 : vector<2x256xi1>, vector<2x256xf32>
    %c1_i32_41 = arith.constant 1 : i32
    %118 = vector.broadcast %c1_i32_41 : i32 to vector<1x256xi32>
    %119 = arith.cmpi sge, %1, %118 : vector<1x256xi32>
    %c16_i32_42 = arith.constant 16 : i32
    %120 = tpu.dynamic_rotate %110 by %c16_i32_42 dim 1 : vector<2x256xf32>, i32 -> vector<2x256xf32>
    %cst_43 = arith.constant 0xFF800000 : f32
    %121 = vector.shape_cast %119 : vector<1x256xi1> to vector<1x256xi1>
    %122 = vector.broadcast %121 : vector<1x256xi1> to vector<2x256xi1>
    %123 = vector.broadcast %cst_43 : f32 to vector<2x256xf32>
    %124 = arith.select %122, %120, %123 : vector<2x256xi1>, vector<2x256xf32>
    %125 = arith.maximumf %124, %117 : vector<2x256xf32>
    %126 = arith.maximumf %110, %125 : vector<2x256xf32>
    %c14_i32_44 = arith.constant 14 : i32
    %127 = vector.broadcast %c14_i32_44 : i32 to vector<1x256xi32>
    %128 = arith.cmpi slt, %1, %127 : vector<1x256xi32>
    %c224_i32_45 = arith.constant 224 : i32
    %129 = tpu.dynamic_rotate %110 by %c224_i32_45 dim 1 : vector<2x256xf32>, i32 -> vector<2x256xf32>
    %cst_46 = arith.constant 0xFF800000 : f32
    %130 = vector.shape_cast %128 : vector<1x256xi1> to vector<1x256xi1>
    %131 = vector.broadcast %130 : vector<1x256xi1> to vector<2x256xi1>
    %132 = vector.broadcast %cst_46 : f32 to vector<2x256xf32>
    %133 = arith.select %131, %129, %132 : vector<2x256xi1>, vector<2x256xf32>
    %c2_i32_47 = arith.constant 2 : i32
    %134 = vector.broadcast %c2_i32_47 : i32 to vector<1x256xi32>
    %135 = arith.cmpi sge, %1, %134 : vector<1x256xi32>
    %c32_i32_48 = arith.constant 32 : i32
    %136 = tpu.dynamic_rotate %110 by %c32_i32_48 dim 1 : vector<2x256xf32>, i32 -> vector<2x256xf32>
    %cst_49 = arith.constant 0xFF800000 : f32
    %137 = vector.shape_cast %135 : vector<1x256xi1> to vector<1x256xi1>
    %138 = vector.broadcast %137 : vector<1x256xi1> to vector<2x256xi1>
    %139 = vector.broadcast %cst_49 : f32 to vector<2x256xf32>
    %140 = arith.select %138, %136, %139 : vector<2x256xi1>, vector<2x256xf32>
    %141 = arith.maximumf %140, %133 : vector<2x256xf32>
    %142 = arith.maximumf %126, %141 : vector<2x256xf32>
    %c15_i32_50 = arith.constant 15 : i32
    %143 = vector.broadcast %c15_i32_50 : i32 to vector<1x256xi32>
    %144 = arith.cmpi slt, %0, %143 : vector<1x256xi32>
    %c255_i32_51 = arith.constant 255 : i32
    %145 = tpu.dynamic_rotate %142 by %c255_i32_51 dim 1 : vector<2x256xf32>, i32 -> vector<2x256xf32>
    %cst_52 = arith.constant 0xFF800000 : f32
    %146 = vector.shape_cast %144 : vector<1x256xi1> to vector<1x256xi1>
    %147 = vector.broadcast %146 : vector<1x256xi1> to vector<2x256xi1>
    %148 = vector.broadcast %cst_52 : f32 to vector<2x256xf32>
    %149 = arith.select %147, %145, %148 : vector<2x256xi1>, vector<2x256xf32>
    %c1_i32_53 = arith.constant 1 : i32
    %150 = vector.broadcast %c1_i32_53 : i32 to vector<1x256xi32>
    %151 = arith.cmpi sge, %0, %150 : vector<1x256xi32>
    %c1_i32_54 = arith.constant 1 : i32
    %152 = tpu.dynamic_rotate %142 by %c1_i32_54 dim 1 : vector<2x256xf32>, i32 -> vector<2x256xf32>
    %cst_55 = arith.constant 0xFF800000 : f32
    %153 = vector.shape_cast %151 : vector<1x256xi1> to vector<1x256xi1>
    %154 = vector.broadcast %153 : vector<1x256xi1> to vector<2x256xi1>
    %155 = vector.broadcast %cst_55 : f32 to vector<2x256xf32>
    %156 = arith.select %154, %152, %155 : vector<2x256xi1>, vector<2x256xf32>
    %157 = arith.maximumf %156, %149 : vector<2x256xf32>
    %158 = arith.maximumf %142, %157 : vector<2x256xf32>
    %c14_i32_56 = arith.constant 14 : i32
    %159 = vector.broadcast %c14_i32_56 : i32 to vector<1x256xi32>
    %160 = arith.cmpi slt, %0, %159 : vector<1x256xi32>
    %c254_i32_57 = arith.constant 254 : i32
    %161 = tpu.dynamic_rotate %142 by %c254_i32_57 dim 1 : vector<2x256xf32>, i32 -> vector<2x256xf32>
    %cst_58 = arith.constant 0xFF800000 : f32
    %162 = vector.shape_cast %160 : vector<1x256xi1> to vector<1x256xi1>
    %163 = vector.broadcast %162 : vector<1x256xi1> to vector<2x256xi1>
    %164 = vector.broadcast %cst_58 : f32 to vector<2x256xf32>
    %165 = arith.select %163, %161, %164 : vector<2x256xi1>, vector<2x256xf32>
    %c2_i32_59 = arith.constant 2 : i32
    %166 = vector.broadcast %c2_i32_59 : i32 to vector<1x256xi32>
    %167 = arith.cmpi sge, %0, %166 : vector<1x256xi32>
    %c2_i32_60 = arith.constant 2 : i32
    %168 = tpu.dynamic_rotate %142 by %c2_i32_60 dim 1 : vector<2x256xf32>, i32 -> vector<2x256xf32>
    %cst_61 = arith.constant 0xFF800000 : f32
    %169 = vector.shape_cast %167 : vector<1x256xi1> to vector<1x256xi1>
    %170 = vector.broadcast %169 : vector<1x256xi1> to vector<2x256xi1>
    %171 = vector.broadcast %cst_61 : f32 to vector<2x256xf32>
    %172 = arith.select %170, %168, %171 : vector<2x256xi1>, vector<2x256xf32>
    %173 = arith.maximumf %172, %165 : vector<2x256xf32>
    %174 = arith.maximumf %158, %173 : vector<2x256xf32>
    %c15_i32_62 = arith.constant 15 : i32
    %175 = vector.broadcast %c15_i32_62 : i32 to vector<1x256xi32>
    %176 = arith.cmpi slt, %1, %175 : vector<1x256xi32>
    %c240_i32_63 = arith.constant 240 : i32
    %177 = tpu.dynamic_rotate %174 by %c240_i32_63 dim 1 : vector<2x256xf32>, i32 -> vector<2x256xf32>
    %cst_64 = arith.constant 0xFF800000 : f32
    %178 = vector.shape_cast %176 : vector<1x256xi1> to vector<1x256xi1>
    %179 = vector.broadcast %178 : vector<1x256xi1> to vector<2x256xi1>
    %180 = vector.broadcast %cst_64 : f32 to vector<2x256xf32>
    %181 = arith.select %179, %177, %180 : vector<2x256xi1>, vector<2x256xf32>
    %c1_i32_65 = arith.constant 1 : i32
    %182 = vector.broadcast %c1_i32_65 : i32 to vector<1x256xi32>
    %183 = arith.cmpi sge, %1, %182 : vector<1x256xi32>
    %c16_i32_66 = arith.constant 16 : i32
    %184 = tpu.dynamic_rotate %174 by %c16_i32_66 dim 1 : vector<2x256xf32>, i32 -> vector<2x256xf32>
    %cst_67 = arith.constant 0xFF800000 : f32
    %185 = vector.shape_cast %183 : vector<1x256xi1> to vector<1x256xi1>
    %186 = vector.broadcast %185 : vector<1x256xi1> to vector<2x256xi1>
    %187 = vector.broadcast %cst_67 : f32 to vector<2x256xf32>
    %188 = arith.select %186, %184, %187 : vector<2x256xi1>, vector<2x256xf32>
    %189 = arith.maximumf %188, %181 : vector<2x256xf32>
    %190 = arith.maximumf %174, %189 : vector<2x256xf32>
    %c14_i32_68 = arith.constant 14 : i32
    %191 = vector.broadcast %c14_i32_68 : i32 to vector<1x256xi32>
    %192 = arith.cmpi slt, %1, %191 : vector<1x256xi32>
    %c224_i32_69 = arith.constant 224 : i32
    %193 = tpu.dynamic_rotate %174 by %c224_i32_69 dim 1 : vector<2x256xf32>, i32 -> vector<2x256xf32>
    %cst_70 = arith.constant 0xFF800000 : f32
    %194 = vector.shape_cast %192 : vector<1x256xi1> to vector<1x256xi1>
    %195 = vector.broadcast %194 : vector<1x256xi1> to vector<2x256xi1>
    %196 = vector.broadcast %cst_70 : f32 to vector<2x256xf32>
    %197 = arith.select %195, %193, %196 : vector<2x256xi1>, vector<2x256xf32>
    %c2_i32_71 = arith.constant 2 : i32
    %198 = vector.broadcast %c2_i32_71 : i32 to vector<1x256xi32>
    %199 = arith.cmpi sge, %1, %198 : vector<1x256xi32>
    %c32_i32_72 = arith.constant 32 : i32
    %200 = tpu.dynamic_rotate %174 by %c32_i32_72 dim 1 : vector<2x256xf32>, i32 -> vector<2x256xf32>
    %cst_73 = arith.constant 0xFF800000 : f32
    %201 = vector.shape_cast %199 : vector<1x256xi1> to vector<1x256xi1>
    %202 = vector.broadcast %201 : vector<1x256xi1> to vector<2x256xi1>
    %203 = vector.broadcast %cst_73 : f32 to vector<2x256xf32>
    %204 = arith.select %202, %200, %203 : vector<2x256xi1>, vector<2x256xf32>
    %205 = arith.maximumf %204, %197 : vector<2x256xf32>
    %206 = arith.maximumf %190, %205 : vector<2x256xf32>
    %c0_74 = arith.constant 0 : index
    %c0_75 = arith.constant 0 : index
    %c0_76 = arith.constant 0 : index
    %207 = vector.load %arg4[%c0_74, %c0_75, %c0_76] : memref<4x8x2xbf16, #tpu.memory_space<vmem>>, vector<1x8x2xbf16>
    %208 = vector.shape_cast %207 : vector<1x8x2xbf16> to vector<8x2xbf16>
    %209 = arith.truncf %14 : vector<2x256xf32> to vector<2x256xbf16>
    %cst_77 = arith.constant dense<0.000000e+00> : vector<8x256xf32>
    %210 = tpu.matmul %208, %209, %cst_77 {dimension_numbers = #tpu.dot_dimension_numbers<[1], [0], [0], [1], [0, 0, 1, 1], [], []>} : vector<8x2xbf16>, vector<2x256xbf16>, vector<8x256xf32> -> vector<8x256xf32>
    %c1 = arith.constant 1 : index
    %c0_78 = arith.constant 0 : index
    %c0_79 = arith.constant 0 : index
    %211 = vector.load %arg4[%c1, %c0_78, %c0_79] : memref<4x8x2xbf16, #tpu.memory_space<vmem>>, vector<1x8x2xbf16>
    %212 = vector.shape_cast %211 : vector<1x8x2xbf16> to vector<8x2xbf16>
    %213 = arith.truncf %78 : vector<2x256xf32> to vector<2x256xbf16>
    %cst_80 = arith.constant dense<0.000000e+00> : vector<8x256xf32>
    %214 = tpu.matmul %212, %213, %cst_80 {dimension_numbers = #tpu.dot_dimension_numbers<[1], [0], [0], [1], [0, 0, 1, 1], [], []>} : vector<8x2xbf16>, vector<2x256xbf16>, vector<8x256xf32> -> vector<8x256xf32>
    %215 = arith.addf %210, %214 : vector<8x256xf32>
    %c2 = arith.constant 2 : index
    %c0_81 = arith.constant 0 : index
    %c0_82 = arith.constant 0 : index
    %216 = vector.load %arg4[%c2, %c0_81, %c0_82] : memref<4x8x2xbf16, #tpu.memory_space<vmem>>, vector<1x8x2xbf16>
    %217 = vector.shape_cast %216 : vector<1x8x2xbf16> to vector<8x2xbf16>
    %218 = arith.truncf %142 : vector<2x256xf32> to vector<2x256xbf16>
    %cst_83 = arith.constant dense<0.000000e+00> : vector<8x256xf32>
    %219 = tpu.matmul %217, %218, %cst_83 {dimension_numbers = #tpu.dot_dimension_numbers<[1], [0], [0], [1], [0, 0, 1, 1], [], []>} : vector<8x2xbf16>, vector<2x256xbf16>, vector<8x256xf32> -> vector<8x256xf32>
    %220 = arith.addf %215, %219 : vector<8x256xf32>
    %c3 = arith.constant 3 : index
    %c0_84 = arith.constant 0 : index
    %c0_85 = arith.constant 0 : index
    %221 = vector.load %arg4[%c3, %c0_84, %c0_85] : memref<4x8x2xbf16, #tpu.memory_space<vmem>>, vector<1x8x2xbf16>
    %222 = vector.shape_cast %221 : vector<1x8x2xbf16> to vector<8x2xbf16>
    %223 = arith.truncf %206 : vector<2x256xf32> to vector<2x256xbf16>
    %cst_86 = arith.constant dense<0.000000e+00> : vector<8x256xf32>
    %224 = tpu.matmul %222, %223, %cst_86 {dimension_numbers = #tpu.dot_dimension_numbers<[1], [0], [0], [1], [0, 0, 1, 1], [], []>} : vector<8x2xbf16>, vector<2x256xbf16>, vector<8x256xf32> -> vector<8x256xf32>
    %225 = arith.addf %220, %224 : vector<8x256xf32>
    %c0_87 = arith.constant 0 : index
    %c0_88 = arith.constant 0 : index
    %226 = vector.load %arg5[%c0_87, %c0_88] : memref<8x1xf32, #tpu.memory_space<vmem>>, vector<8x1xf32>
    %227 = vector.broadcast %226 : vector<8x1xf32> to vector<8x256xf32>
    %228 = arith.addf %225, %227 : vector<8x256xf32>
    %cst_89 = arith.constant 0.000000e+00 : f32
    %229 = vector.broadcast %cst_89 : f32 to vector<8x256xf32>
    %230 = arith.cmpf ogt, %228, %229 : vector<8x256xf32>
    %cst_90 = arith.constant 1.000000e-01 : f32
    %231 = vector.broadcast %cst_90 : f32 to vector<8x256xf32>
    %232 = arith.mulf %231, %228 : vector<8x256xf32>
    %233 = arith.select %230, %228, %232 : vector<8x256xi1>, vector<8x256xf32>
    %c0_91 = arith.constant 0 : index
    %c0_92 = arith.constant 0 : index
    %c0_93 = arith.constant 0 : index
    %234 = vector.load %arg8[%c0_91, %c0_92, %c0_93] : memref<1x8x256xf32, #tpu.memory_space<vmem>>, vector<1x8x256xf32>
    %235 = vector.shape_cast %234 : vector<1x8x256xf32> to vector<8x256xf32>
    %236 = vector.shape_cast %233 : vector<8x256xf32> to vector<1x8x256xf32>
    tpu.vector_store %arg8[%c0_91, %c0_92, %c0_93], %236 {strides = array<i32>} : memref<1x8x256xf32, #tpu.memory_space<vmem>>, vector<1x8x256xf32>,
    return
  }
  func.func @transform_0(%arg0: i32) -> (i32, i32, i32) {
    %c0_i32 = arith.constant 0 : i32
    %c0_i32_0 = arith.constant 0 : i32
    %c0_i32_1 = arith.constant 0 : i32
    return %arg0, %c0_i32, %c0_i32_0 : i32, i32, i32
  }
  func.func @transform_1(%arg0: i32) -> (i32, i32) {
    %c0_i32 = arith.constant 0 : i32
    %c0_i32_0 = arith.constant 0 : i32
    %c0_i32_1 = arith.constant 0 : i32
    return %c0_i32, %c0_i32_0 : i32, i32
  }
  func.func @transform_2(%arg0: i32) -> (i32, i32) {
    %c0_i32 = arith.constant 0 : i32
    %c0_i32_0 = arith.constant 0 : i32
    %c0_i32_1 = arith.constant 0 : i32
    return %c0_i32, %c0_i32_0 : i32, i32
  }
  func.func @transform_3(%arg0: i32) -> (i32, i32, i32) {
    %c0_i32 = arith.constant 0 : i32
    %c0_i32_0 = arith.constant 0 : i32
    %c0_i32_1 = arith.constant 0 : i32
    %c0_i32_2 = arith.constant 0 : i32
    return %c0_i32, %c0_i32_0, %c0_i32_1 : i32, i32, i32
  }
  func.func @transform_4(%arg0: i32) -> (i32, i32) {
    %c0_i32 = arith.constant 0 : i32
    %c0_i32_0 = arith.constant 0 : i32
    %c0_i32_1 = arith.constant 0 : i32
    return %c0_i32, %c0_i32_0 : i32, i32
  }
  func.func @transform_5(%arg0: i32) -> (i32, i32) {
    %c0_i32 = arith.constant 0 : i32
    %c0_i32_0 = arith.constant 0 : i32
    %c0_i32_1 = arith.constant 0 : i32
    return %c0_i32, %c0_i32_0 : i32, i32
  }
  func.func @transform_6(%arg0: i32) -> (i32, i32) {
    %c0_i32 = arith.constant 0 : i32
    %c0_i32_0 = arith.constant 0 : i32
    %c0_i32_1 = arith.constant 0 : i32
    return %c0_i32, %c0_i32_0 : i32, i32
  }
  func.func @transform_7(%arg0: i32) -> (i32, i32, i32) {
    %c0_i32 = arith.constant 0 : i32
    %c0_i32_0 = arith.constant 0 : i32
    %c0_i32_1 = arith.constant 0 : i32
    return %arg0, %c0_i32, %c0_i32_0 : i32, i32, i32
  }
}

</mosaic_0001>

<bundles_post_ra>
// kernel: spp_forward.1
= control target key start
LH: loop header
LB: loop body
LE: loop exit
PB: predicated region body
PF: predicated region fallthrough
CT: control target
= control target key end

     0   :  { %s1093_s24 = smov 0   ;;  %s1477_s0 = inlined_call_operand.vmem [shape: f32[2,4,256], index: 0, kind: input, shape index: {}]   ;;  %s1478_s1 = inlined_call_operand.vmem [shape: bf16[2,4], index: 1, kind: input, shape index: {}]   ;;  %s1479_s2 = inlined_call_operand.vmem [shape: f32[2,1], index: 2, kind: input, shape index: {}]   ;;  %s1480_s3 = inlined_call_operand.vmem [shape: bf16[4,8,2], index: 3, kind: input, shape index: {}]   ;;  %s1481_s4 = inlined_call_operand.vmem [shape: f32[8,1], index: 4, kind: input, shape index: {}]   ;;  %s1482_s5 = inlined_call_operand.vmem [shape: s32[1,256], index: 5, kind: input, shape index: {}]   ;;  %s1483_s6 = inlined_call_operand.vmem [shape: s32[1,256], index: 6, kind: input, shape index: {}]   ;;  %s1484_s7 = inlined_call_operand.vmem [shape: f32[2,8,256], index: 7, kind: output, shape index: {}]  }
   0x1 LB: > { %s871_s25 = sadd.s32 4294967295, %s1042_s24   ;;  %p875_p0 = scmp.ge.s32.totalorder %s1042_s24, 1  ;;  %s1042_s24 = sphi %s1093_s24, %s17_s24  }
   0x2   : > { %p237_p1 = scmp.lt.s32.totalorder %s1042_s24, 3 }
   0x4   : > { %p238_p2 = pnand %p875_p0, %p237_p1 }
   0x5   : > { %p269_p3 = scmp.lt.s32.totalorder (!%p238_p2), %s871_s25, 1  ;;  %s1045_s11 = smov (!%p238_p2), 2  }
   0x6   : > { %241 = sbr.rel (%p238_p2) target bundleno = 1090 (0x442), region = 48  ;;  %s1046_s12 = smov (!%p238_p2), 1  }
   0x7   : > { %s1047_s13 = smov (!%p238_p2), 127   ;;  %s1048_s14 = smov (!%p238_p2), 126  }
   0x8   : > { %s1049_s17 = smov (!%p238_p2), 96   ;;  %s1050_s18 = smov (!%p238_p2), 16  }
   0x9   : > { %s1051_s19 = smov (!%p238_p2), 112   ;;  %s1052_s20 = smov (!%p238_p2), 32  }
   0xb   : > { %v1044_v0 = vmov 0   ;;  %v292_v1 = vld [vmem:[%s1479_s2] sm:$0x3]  ;;  %s1590_s25 = smov (!%p269_p3, %s871_s25), 1  ;;  %vm302_vm0 = vcmask 1041408   ;;  %vm298_vm1 = vcmask 31744   ;;  %v346_v28 = vlaneseq }
   0xc   : > { %914 = vset.pattern.permute.xlu0 %v1044_v0  ;;  %1035 = vset.pattern.permute.xlu1 %v1044_v0  ;;  %s895_s28 = sshll.u32 %s1590_s25, 3  ;;  %v291_v9 = vld [vmem:[%s1478_s1] sm:$0x1]  ;;  %vm1489_vm4 = vcmask 1040384   ;;  %v1505_v39 = vmov 0  ;;  %v1507_v40 = vmov 0 }
   0xd   : > { %295 = vperm.xlu0 %914, %v292_v1   ;;  %s273_s8 = scalar_lea.vmem %s1477_s0, %s895_s28  ;;  %v280_v26 = vld [vmem:[%s1482_s5] sm:$0x3]  ;;  %v1137_v33 = vand.u32 127, %v346_v28  ;;  %v1513_v62 = vmov 0  ;;  %v1515_v63 = vmov 0 }
   0xe   : > { %v282_v2 = vld [vmem:[%s273_s8] sm:$0xff]  ;;  %vm358_vm5 = vcmp.ge.s32.totalorder %v280_v26, 1  ;;  %vm341_vm6 = vcmp.lt.s32.totalorder %v280_v26, 15  ;;  %vm392_vm7 = vcmp.ge.s32.totalorder %v280_v26, 2  ;;  %vm377_vm8 = vcmp.lt.s32.totalorder %v280_v26, 14 }
   0xf   : > { %284 = vst [vmem:[#allocation1] ss:$2 sm:$0xff] %v282_v2  ;;  %v366_v27 = vsel %vm358_vm5, 1, %v1044_v0  ;;  %v351_v29 = vsel %vm341_vm6, 1, %v1044_v0  ;;  %v400_v30 = vsel %vm392_vm7, 1, %v1044_v0  ;;  %vm1488_vm9 = vcmp.lt.s32.totalorder %v1137_v33, 1 }
  0x10   : > { %v367_v31 = vperm.slane %v366_v27, 0  ;;  %v368_v32 = vperm.slane %v366_v27, 1  ;;  %v352_v34 = vperm.slane %v351_v29, 0  ;;  %v353_v35 = vperm.slane %v351_v29, 1 }
  0x11   : > { %v401_v36 = vperm.slane %v400_v30, 0  ;;  %v402_v37 = vperm.slane %v400_v30, 1  ;;  %vm1487_vm12 = vcmp.lt.s32.totalorder %v1137_v33, 127  ;;  %v385_v45 = vsel %vm377_vm8, 1, %v1044_v0 }
  0x12   : > { %vm1140_vm10 = vcmp.eq.s32.totalorder %v367_v31, 1  ;;  %vm1144_vm11 = vcmp.eq.s32.totalorder %v368_v32, 1  ;;  %vm1150_vm13 = vcmp.eq.s32.totalorder %v352_v34, 1  ;;  %vm1154_vm14 = vcmp.eq.s32.totalorder %v353_v35, 1 }
  0x13   : > { %v1506_v39 = vsel %vm1140_vm10, 4294967295, %v1505_v39  ;;  %v1508_v40 = vsel %vm1144_vm11, 4294967295, %v1507_v40  ;;  %v386_v56 = vperm.slane %v385_v45, 0  ;;  %v387_v57 = vperm.slane %v385_v45, 1 }
  0x14   : > { %vm1485_vm15 = vcmp.lt.s32.totalorder %v1137_v33, 2  ;;  %v1527_v45 = vmov 0 }
  0x15   : > { %vm1192_vm5 = vcmp.eq.s32.totalorder %v387_v57, 1 }
  0x16   : > { %v285_v3 = vld.sshfl [vmem:[#allocation1] sm:$0xff pattern:$0x75316420]  ;;  %v286_v4 = vld.sshfl [vmem:[#allocation1 + $0x8] sm:$0xff pattern:$0x75316420] }
  0x17   : > { %v289_v5 = vpack.c.bf16 %v285_v3, %v285_v3  ;;  %v290_v6 = vpack.c.bf16 %v286_v4, %v286_v4  ;;  %v1517_v3 = vmov 0  ;;  %v1519_v4 = vmov 0 }
  0x18   : > { %v1520_v4 = vsel %vm1192_vm5, 4294967295, %v1519_v4 }
  0x19   : > { %v304_v7 = vsel %vm302_vm0, %v289_v5, 0  ;;  %v307_v8 = vsel %vm302_vm0, %v290_v6, 0  ;;  %vm1175_vm0 = vcmp.eq.s32.totalorder %v401_v36, 1 }
  0x1a   : > { %316 = vmatpush.bf16.msra.mxu0 %v304_v7  ;;  %329 = vmatpush.bf16.msra.mxu1 %v307_v8  ;;  %v1514_v62 = vsel %vm1175_vm0, 4294967295, %v1513_v62 }
  0x1d   : > { %880 = vmatmul.msk.bf16.vlgmr.msra.gmra.mxu0 %vm298_vm1, %v291_v9  ;;  %881 = vmatmul.msk.bf16.vlgmr.msra.gmra.mxu1 %vm298_vm1, %v291_v9  ;;  %vm1179_vm1 = vcmp.eq.s32.totalorder %v402_v37, 1 }
  0x1e   : > { %v1516_v63 = vsel %vm1179_vm1, 4294967295, %v1515_v63 }
  0x7f   : > { %v296_v10 = vpop.permute.xlu0 %295 }
  0x9a   : > { %v318_v11 = vpop.f32.mrf.mxu0  ;;  %v331_v12 = vpop.f32.mrf.mxu1 }
  0x9b   : > { %v319_v13 = vadd.f32 %v318_v11, %v296_v10  ;;  %v332_v14 = vadd.f32 %v331_v12, %v296_v10 }
  0x9d   : > { %vm335_vm2 = vcmp.gt.f32.partialorder %v319_v13, 0.0  ;;  %v337_v15 = vmul.f32 0.1, %v319_v13  ;;  %vm336_vm3 = vcmp.gt.f32.partialorder %v332_v14, 0.0  ;;  %v338_v16 = vmul.f32 0.1, %v332_v14 }
  0x9f   : > { %v1115_v17 = vsel %vm335_vm2, %v319_v13, %v337_v15  ;;  %v1117_v18 = vsel %vm336_vm3, %v332_v14, %v338_v16  ;;  %vm1486_vm2 = vcmp.lt.s32.totalorder %v1137_v33, 126  ;;  %vm1188_vm3 = vcmp.eq.s32.totalorder %v386_v56, 1 }
  0xa0   : > { %v930_v19 = vpack.i.bf16 %v1117_v18, %v1115_v17  ;;  %v640_v20 = vpack.c.bf16 %v1115_v17, %v1115_v17  ;;  %v641_v21 = vpack.c.bf16 %v1117_v18, %v1117_v18  ;;  %v1518_v3 = vsel %vm1188_vm3, 4294967295, %v1517_v3 }
  0xa2   : > { %v320_v22 = vpop.f32.mrf.mxu0  ;;  %v333_v23 = vpop.f32.mrf.mxu1  ;;  %931 = vrot.lane.b32.xlu2 %v930_v19, %s1045_s11  ;;  %921 = vrot.lane.b32.xlu1 %v930_v19, %s1046_s12  ;;  %v687_v24 = vsel %vm1489_vm4, %v640_v20, 0  ;;  %v690_v25 = vsel %vm1489_vm4, %v641_v21, 0 }
  0xa3   : > { %916 = vrot.lane.b32.xlu0 %v930_v19, %s1047_s13  ;;  %699 = vmatpush.bf16.msrb.mxu0 %v687_v24 }
  0xa4   : > { %712 = vmatpush.bf16.msrb.mxu1 %v690_v25 }
  0xaa   : > { %926 = vrot.lane.b32.xlu1 %v930_v19, %s1048_s14 }
  0xfc   : > { %v932_v38 = vpop.permute.xlu2 %931 }
  0xfd   : > { %v934_v50 = vunpack.i.h.bf16 %v932_v38  ;;  %v933_v51 = vunpack.i.l.bf16 %v932_v38 }
  0xff   : > { %v398_v1 = vsel %vm1485_vm15, %v933_v51, %v934_v50  ;;  %v399_v2 = vsel %vm1485_vm15, %v934_v50, %v933_v51 }
 0x100   : > { %v405_v12 = vsel %vm1175_vm0, %v399_v2, -inf  ;;  %v406_v13 = vsel %vm1179_vm1, %v398_v1, -inf }
 0x114   : > { %v922_v41 = vpop.permute.xlu1 %921 }
 0x115   : > { %v924_v42 = vunpack.i.h.bf16 %v922_v41  ;;  %v923_v43 = vunpack.i.l.bf16 %v922_v41  ;;  %v917_v44 = vpop.permute.xlu0 %916 }
 0x116   : > { %v919_v48 = vunpack.i.h.bf16 %v917_v44  ;;  %v918_v49 = vunpack.i.l.bf16 %v917_v44 }
 0x117   : > { %v364_v52 = vsel %vm1488_vm9, %v923_v43, %v924_v42  ;;  %v365_v53 = vsel %vm1488_vm9, %v924_v42, %v923_v43  ;;  %v1521_v43 = vmov 0  ;;  %vm1501_vm9 = vcmp.lt.s32.totalorder %v1137_v33, 96 }
 0x118   : > { %v349_v54 = vsel %vm1487_vm12, %v918_v49, %v919_v48  ;;  %v350_v55 = vsel %vm1487_vm12, %v919_v48, %v918_v49  ;;  %v371_v58 = vsel %vm1140_vm10, %v365_v53, -inf  ;;  %v372_v59 = vsel %vm1144_vm11, %v364_v52, -inf }
 0x119   : > { %v356_v60 = vsel %vm1150_vm13, %v349_v54, -inf  ;;  %v357_v61 = vsel %vm1154_vm14, %v350_v55, -inf }
 0x11a   : > { %v373_v6 = vmax.f32 %v371_v58, %v356_v60  ;;  %v374_v7 = vmax.f32 %v372_v59, %v357_v61 }
 0x11c   : > { %v927_v5 = vpop.permute.xlu1 %926  ;;  %v375_v16 = vmax.f32 %v1115_v17, %v373_v6  ;;  %v376_v19 = vmax.f32 %v1117_v18, %v374_v7  ;;  %v281_v17 = vld [vmem:[%s1483_s6] sm:$0x3] }
 0x11d   : > { %v929_v8 = vunpack.i.h.bf16 %v927_v5  ;;  %v928_v9 = vunpack.i.l.bf16 %v927_v5  ;;  %vm411_vm6 = vcmp.lt.s32.totalorder %v281_v17, 15  ;;  %vm460_vm7 = vcmp.ge.s32.totalorder %v281_v17, 2 }
 0x11e   : > { %vm445_vm8 = vcmp.lt.s32.totalorder %v281_v17, 14  ;;  %v419_v25 = vsel %vm411_vm6, 1, %v1044_v0  ;;  %vm426_vm15 = vcmp.ge.s32.totalorder %v281_v17, 1  ;;  %v468_v26 = vsel %vm460_vm7, 1, %v1044_v0 }
 0x11f   : > { %v383_v10 = vsel %vm1486_vm2, %v928_v9, %v929_v8  ;;  %v384_v11 = vsel %vm1486_vm2, %v929_v8, %v928_v9  ;;  %v453_v27 = vsel %vm445_vm8, 1, %v1044_v0  ;;  %v420_v28 = vperm.slane %v419_v25, 0 }
 0x120   : > { %v390_v14 = vsel %vm1188_vm3, %v383_v10, -inf  ;;  %v391_v15 = vsel %vm1192_vm5, %v384_v11, -inf  ;;  %v421_v29 = vperm.slane %v419_v25, 1  ;;  %v434_v30 = vsel %vm426_vm15, 1, %v1044_v0  ;;  %v890_v0 = vld [vmem:[%s1480_s3 + $0xc] sm:$0xf] }
 0x121   : > { %v407_v20 = vmax.f32 %v405_v12, %v390_v14  ;;  %v408_v21 = vmax.f32 %v406_v13, %v391_v15  ;;  %v469_v31 = vperm.slane %v468_v26, 0  ;;  %v470_v32 = vperm.slane %v468_v26, 1 }
 0x122   : > { %v454_v37 = vperm.slane %v453_v27, 0  ;;  %vm1496_vm2 = vcmp.lt.s32.totalorder %v1137_v33, 112  ;;  %v455_v38 = vperm.slane %v453_v27, 1  ;;  %v435_v41 = vperm.slane %v434_v30, 0 }
 0x123   : > { %v1210_v22 = vmax.f32 %v375_v16, %v407_v20  ;;  %v1212_v23 = vmax.f32 %v376_v19, %v408_v21  ;;  %v436_v42 = vperm.slane %v434_v30, 1  ;;  %vm1228_vm6 = vcmp.eq.s32.totalorder %v420_v28, 1 }
 0x124   : > { %v1522_v43 = vsel %vm1228_vm6, 4294967295, %v1521_v43  ;;  %vm1232_vm7 = vcmp.eq.s32.totalorder %v421_v29, 1  ;;  %vm1237_vm8 = vcmp.eq.s32.totalorder %v469_v31, 1  ;;  %vm1241_vm12 = vcmp.eq.s32.totalorder %v470_v32, 1 }
 0x125   : > { %v945_v24 = vpack.i.bf16 %v1212_v23, %v1210_v22  ;;  %v1528_v45 = vsel %vm1241_vm12, 4294967295, %v1527_v45  ;;  %vm1250_vm4 = vcmp.eq.s32.totalorder %v454_v37, 1  ;;  %vm1254_vm15 = vcmp.eq.s32.totalorder %v455_v38, 1 }
 0x126   : > { %vm1259_vm0 = vcmp.eq.s32.totalorder %v435_v41, 1  ;;  %vm1263_vm5 = vcmp.eq.s32.totalorder %v436_v42, 1  ;;  %vm1539_vm3 = vcmp.lt.s32.totalorder %v1137_v33, 16 }
 0x127   : > { %946 = vrot.lane.b32.xlu1 %v945_v24, %s1049_s17  ;;  %941 = vrot.lane.b32.xlu0 %v945_v24, %s1050_s18 }
 0x128   : > { %936 = vrot.lane.b32.xlu2 %v945_v24, %s1051_s19 }
 0x130   : > { %951 = vrot.lane.b32.xlu2 %v945_v24, %s1052_s20 }
 0x182   : > { %v937_v18 = vpop.permute.xlu2 %936 }
 0x183   : > { %v939_v34 = vunpack.i.h.bf16 %v937_v18  ;;  %v938_v35 = vunpack.i.l.bf16 %v937_v18 }
 0x185   : > { %v417_v50 = vsel %vm1496_vm2, %v938_v35, %v939_v34  ;;  %v418_v51 = vsel %vm1496_vm2, %v939_v34, %v938_v35  ;;  %vm1537_vm2 = vcmp.lt.s32.totalorder %v1137_v33, 32 }
 0x186   : > { %v424_v1 = vsel %vm1228_vm6, %v417_v50, -inf  ;;  %v425_v2 = vsel %vm1232_vm7, %v418_v51, -inf  ;;  %vm1538_vm1 = vmmov %vm1537_vm2 }
 0x187   : > { %vm1540_vm6 = vmmov %vm1539_vm3 }
 0x18a   : > { %v952_v36 = vpop.permute.xlu2 %951 }
 0x18b   : > { %v954_v48 = vunpack.i.h.bf16 %v952_v36  ;;  %v953_v49 = vunpack.i.l.bf16 %v952_v36 }
 0x18d   : > { %v466_v5 = vsel %vm1537_vm2, %v953_v49, %v954_v48  ;;  %v467_v6 = vsel %vm1538_vm1, %v954_v48, %v953_v49  ;;  %vm1541_vm1 = vcmask 1040384  }
 0x18e   : > { %v473_v19 = vsel %vm1237_vm8, %v467_v6, -inf  ;;  %v474_v20 = vsel %vm1241_vm12, %v466_v5, -inf  ;;  %vm1542_vm2 = vmmov %vm1541_vm1 }
 0x199   : > { %v947_v54 = vpop.permute.xlu1 %946  ;;  %v942_v57 = vpop.permute.xlu0 %941 }
 0x19a   : > { %v949_v58 = vunpack.i.h.bf16 %v947_v54  ;;  %v948_v59 = vunpack.i.l.bf16 %v947_v54  ;;  %v944_v60 = vunpack.i.h.bf16 %v942_v57  ;;  %v943_v61 = vunpack.i.l.bf16 %v942_v57 }
 0x19c   : > { %v451_v7 = vsel %vm1501_vm9, %v948_v59, %v949_v58  ;;  %v452_v8 = vsel %vm1501_vm9, %v949_v58, %v948_v59  ;;  %v432_v9 = vsel %vm1539_vm3, %v943_v61, %v944_v60  ;;  %v433_v10 = vsel %vm1540_vm6, %v944_v60, %v943_v61 }
 0x19d   : > { %v458_v11 = vsel %vm1250_vm4, %v451_v7, -inf  ;;  %v459_v12 = vsel %vm1254_vm15, %v452_v8, -inf  ;;  %v439_v13 = vsel %vm1259_vm0, %v433_v10, -inf  ;;  %v440_v14 = vsel %vm1263_vm5, %v432_v9, -inf }
 0x19e   : > { %v441_v15 = vmax.f32 %v439_v13, %v424_v1  ;;  %v442_v16 = vmax.f32 %v440_v14, %v425_v2  ;;  %v475_v21 = vmax.f32 %v473_v19, %v458_v11  ;;  %v476_v24 = vmax.f32 %v474_v20, %v459_v12 }
 0x19f   : > { %vm1543_vm3 = vcmp.lt.s32.totalorder %v1137_v33, 1  ;;  %vm1551_vm9 = vnez %v1518_v3 }
 0x1a0   : > { %v443_v17 = vmax.f32 %v1210_v22, %v441_v15  ;;  %v444_v18 = vmax.f32 %v1212_v23, %v442_v16  ;;  %vm1544_vm6 = vmmov %vm1543_vm3 }
 0x1a2   : > { %v477_v25 = vmax.f32 %v443_v17, %v475_v21  ;;  %v478_v26 = vmax.f32 %v444_v18, %v476_v24 }
 0x1a4   : > { %v965_v27 = vpack.i.bf16 %v478_v26, %v477_v25  ;;  %v644_v28 = vpack.c.bf16 %v477_v25, %v477_v25  ;;  %v645_v29 = vpack.c.bf16 %v478_v26, %v478_v26 }
 0x1a6   : > { %966 = vrot.lane.b32.xlu2 %v965_v27, %s1048_s14  ;;  %961 = vrot.lane.b32.xlu1 %v965_v27, %s1046_s12  ;;  %v652_v30 = vsel %vm1541_vm1, %v644_v28, 0  ;;  %v655_v31 = vsel %vm1542_vm2, %v645_v29, 0  ;;  %vm1545_vm1 = vcmp.lt.s32.totalorder %v1137_v33, 127 }
 0x1a7   : > { %956 = vrot.lane.b32.xlu0 %v965_v27, %s1047_s13  ;;  %664 = vmatpush.bf16.msra.mxu2 %v652_v30  ;;  %vm1546_vm2 = vmmov %vm1545_vm1 }
 0x1a8   : > { %677 = vmatpush.bf16.msra.mxu3 %v655_v31 }
 0x1af   : > { %971 = vrot.lane.b32.xlu0 %v965_v27, %s1045_s11 }
 0x200   : > { %v967_v35 = vpop.permute.xlu2 %966 }
 0x201   : > { %v969_v49 = vunpack.i.h.bf16 %v967_v35  ;;  %v968_v50 = vunpack.i.l.bf16 %v967_v35 }
 0x218   : > { %v962_v22 = vpop.permute.xlu1 %961 }
 0x219   : > { %v964_v23 = vunpack.i.h.bf16 %v962_v22  ;;  %v963_v32 = vunpack.i.l.bf16 %v962_v22  ;;  %v957_v34 = vpop.permute.xlu0 %956 }
 0x21a   : > { %v959_v36 = vunpack.i.h.bf16 %v957_v34  ;;  %v958_v37 = vunpack.i.l.bf16 %v957_v34 }
 0x21b   : > { %v491_v38 = vsel %vm1543_vm3, %v963_v32, %v964_v23  ;;  %v492_v41 = vsel %vm1544_vm6, %v964_v23, %v963_v32  ;;  %vm1547_vm3 = vcmp.lt.s32.totalorder %v1137_v33, 126 }
 0x21c   : > { %v483_v42 = vsel %vm1545_vm1, %v958_v37, %v959_v36  ;;  %v484_v48 = vsel %vm1546_vm2, %v959_v36, %v958_v37  ;;  %v493_v51 = vsel %vm1140_vm10, %v492_v41, -inf  ;;  %v494_v54 = vsel %vm1144_vm11, %v491_v38, -inf  ;;  %vm1548_vm6 = vmmov %vm1547_vm3 }
 0x21d   : > { %v485_v57 = vsel %vm1150_vm13, %v483_v42, -inf  ;;  %v486_v58 = vsel %vm1154_vm14, %v484_v48, -inf  ;;  %v503_v59 = vsel %vm1547_vm3, %v968_v50, %v969_v49  ;;  %v504_v60 = vsel %vm1548_vm6, %v969_v49, %v968_v50 }
 0x21e   : > { %v495_v1 = vmax.f32 %v493_v51, %v485_v57  ;;  %v496_v2 = vmax.f32 %v494_v54, %v486_v58  ;;  %vm1549_vm1 = vcmp.lt.s32.totalorder %v1137_v33, 2  ;;  %v505_v9 = vsel %vm1551_vm9, %v503_v59, -inf }
 0x21f   : > { %vm1550_vm2 = vmmov %vm1549_vm1  ;;  %vm1552_vm11 = vnez %v1520_v4  ;;  %vm1553_vm3 = vnez %v1514_v62  ;;  %vm1554_vm6 = vnez %v1516_v63  ;;  %vm1559_vm10 = vnez %v1522_v43 }
 0x220   : > { %v506_v10 = vsel %vm1552_vm11, %v504_v60, -inf  ;;  %v497_v13 = vmax.f32 %v477_v25, %v495_v1  ;;  %v498_v14 = vmax.f32 %v478_v26, %v496_v2 }
 0x221   : > { %v972_v61 = vpop.permute.xlu0 %971 }
 0x222   : > { %v974_v5 = vunpack.i.h.bf16 %v972_v61  ;;  %v973_v6 = vunpack.i.l.bf16 %v972_v61 }
 0x224   : > { %v511_v7 = vsel %vm1549_vm1, %v973_v6, %v974_v5  ;;  %v512_v8 = vsel %vm1550_vm2, %v974_v5, %v973_v6  ;;  %vm1555_vm1 = vcmp.lt.s32.totalorder %v1137_v33, 112 }
 0x225   : > { %v513_v11 = vsel %vm1553_vm3, %v512_v8, -inf  ;;  %v514_v12 = vsel %vm1554_vm6, %v511_v7, -inf  ;;  %vm1556_vm2 = vmmov %vm1555_vm1  ;;  %vm1557_vm6 = vcmp.lt.s32.totalorder %v1137_v33, 16 }
 0x226   : > { %v515_v15 = vmax.f32 %v513_v11, %v505_v9  ;;  %v516_v16 = vmax.f32 %v514_v12, %v506_v10  ;;  %vm1558_vm3 = vmmov %vm1557_vm6 }
 0x228   : > { %v517_v19 = vmax.f32 %v497_v13, %v515_v15  ;;  %v518_v20 = vmax.f32 %v498_v14, %v516_v16 }
 0x22a   : > { %v985_v21 = vpack.i.bf16 %v518_v20, %v517_v19 }
 0x22c   : > { %986 = vrot.lane.b32.xlu0 %v985_v21, %s1049_s17  ;;  %981 = vrot.lane.b32.xlu2 %v985_v21, %s1050_s18 }
 0x22d   : > { %976 = vrot.lane.b32.xlu1 %v985_v21, %s1051_s19 }
 0x235   : > { %991 = vrot.lane.b32.xlu1 %v985_v21, %s1052_s20 }
 0x286   : > { %v982_v24 = vpop.permute.xlu2 %981 }
 0x287   : > { %v984_v18 = vunpack.i.h.bf16 %v982_v24  ;;  %v983_v27 = vunpack.i.l.bf16 %v982_v24 }
 0x289   : > { %v531_v23 = vsel %vm1557_vm6, %v983_v27, %v984_v18  ;;  %v532_v32 = vsel %vm1558_vm3, %v984_v18, %v983_v27  ;;  %vm1562_vm3 = vcmp.lt.s32.totalorder %v1137_v33, 32 }
 0x28a   : > { %v533_v36 = vsel %vm1259_vm0, %v532_v32, -inf  ;;  %v534_v37 = vsel %vm1263_vm5, %v531_v23, -inf }
 0x29e   : > { %v987_v28 = vpop.permute.xlu0 %986 }
 0x29f   : > { %v977_v17 = vpop.permute.xlu1 %976  ;;  %v989_v31 = vunpack.i.h.bf16 %v987_v28  ;;  %v988_v22 = vunpack.i.l.bf16 %v987_v28 }
 0x2a0   : > { %v979_v25 = vunpack.i.h.bf16 %v977_v17  ;;  %v978_v26 = vunpack.i.l.bf16 %v977_v17 }
 0x2a2   : > { %v523_v29 = vsel %vm1555_vm1, %v978_v26, %v979_v25  ;;  %v524_v30 = vsel %vm1556_vm2, %v979_v25, %v978_v26  ;;  %vm1560_vm1 = vcmp.lt.s32.totalorder %v1137_v33, 96  ;;  %vm1563_vm2 = vmmov %vm1562_vm3 }
 0x2a3   : > { %v525_v34 = vsel %vm1559_vm10, %v523_v29, -inf  ;;  %v526_v35 = vsel %vm1232_vm7, %v524_v30, -inf  ;;  %v543_v38 = vsel %vm1560_vm1, %v988_v22, %v989_v31  ;;  %vm1561_vm6 = vmmov %vm1560_vm1  ;;  %vm1564_vm1 = vcmask 1040384  }
 0x2a4   : > { %v544_v41 = vsel %vm1561_vm6, %v989_v31, %v988_v22  ;;  %v535_v48 = vmax.f32 %v533_v36, %v525_v34  ;;  %v536_v49 = vmax.f32 %v534_v37, %v526_v35  ;;  %v545_v58 = vsel %vm1250_vm4, %v543_v38, -inf  ;;  %vm1565_vm6 = vmmov %vm1564_vm1 }
 0x2a5   : > { %v546_v59 = vsel %vm1254_vm15, %v544_v41, -inf }
 0x2a6   : > { %v537_v1 = vmax.f32 %v517_v19, %v535_v48  ;;  %v538_v2 = vmax.f32 %v518_v20, %v536_v49 }
 0x2a7   : > { %v992_v42 = vpop.permute.xlu1 %991 }
 0x2a8   : > { %v994_v50 = vunpack.i.h.bf16 %v992_v42  ;;  %v993_v51 = vunpack.i.l.bf16 %v992_v42 }
 0x2aa   : > { %v551_v54 = vsel %vm1562_vm3, %v993_v51, %v994_v50  ;;  %v552_v57 = vsel %vm1563_vm2, %v994_v50, %v993_v51  ;;  %vm1566_vm3 = vcmp.lt.s32.totalorder %v1137_v33, 127 }
 0x2ab   : > { %v553_v60 = vsel %vm1237_vm8, %v552_v57, -inf  ;;  %v554_v61 = vsel %vm1241_vm12, %v551_v54, -inf  ;;  %vm1567_vm2 = vmmov %vm1566_vm3  ;;  %vm1572_vm12 = vcmp.lt.s32.totalorder %v1137_v33, 1 }
 0x2ac   : > { %v555_v5 = vmax.f32 %v553_v60, %v545_v58  ;;  %v556_v6 = vmax.f32 %v554_v61, %v546_v59 }
 0x2ae   : > { %v557_v7 = vmax.f32 %v537_v1, %v555_v5  ;;  %v558_v8 = vmax.f32 %v538_v2, %v556_v6 }
 0x2b0   : > { %v1005_v9 = vpack.i.bf16 %v558_v8, %v557_v7  ;;  %v720_v10 = vpack.c.bf16 %v557_v7, %v557_v7  ;;  %v721_v11 = vpack.c.bf16 %v558_v8, %v558_v8 }
 0x2b2   : > { %1006 = vrot.lane.b32.xlu1 %v1005_v9, %s1048_s14  ;;  %1001 = vrot.lane.b32.xlu0 %v1005_v9, %s1046_s12  ;;  %v726_v12 = vsel %vm1564_vm1, %v720_v10, 0  ;;  %v729_v13 = vsel %vm1565_vm6, %v721_v11, 0  ;;  %vm1568_vm1 = vcmp.lt.s32.totalorder %v1137_v33, 2  ;;  %s896_s12 = sshll.u32 %s1590_s25, 4 }
 0x2b3   : > { %996 = vrot.lane.b32.xlu2 %v1005_v9, %s1047_s13  ;;  %738 = vmatpush.bf16.msrb.mxu2 %v726_v12  ;;  %vm1569_vm6 = vmmov %vm1568_vm1  ;;  %s278_s15 = scalar_lea.vmem %s1484_s7, %s896_s12 }
 0x2b4   : > { %751 = vmatpush.bf16.msrb.mxu3 %v729_v13 }
 0x2bb   : > { %1011 = vrot.lane.b32.xlu2 %v1005_v9, %s1045_s11 }
 0x30d   : > { %v997_v14 = vpop.permute.xlu2 %996 }
 0x30e   : > { %v999_v15 = vunpack.i.h.bf16 %v997_v14  ;;  %v998_v16 = vunpack.i.l.bf16 %v997_v14 }
 0x310   : > { %v563_v24 = vsel %vm1566_vm3, %v998_v16, %v999_v15  ;;  %v564_v17 = vsel %vm1567_vm2, %v999_v15, %v998_v16  ;;  %vm1570_vm3 = vcmp.lt.s32.totalorder %v1137_v33, 126 }
 0x311   : > { %v565_v30 = vsel %vm1150_vm13, %v563_v24, -inf  ;;  %v566_v31 = vsel %vm1154_vm14, %v564_v17, -inf  ;;  %vm1571_vm2 = vmmov %vm1570_vm3  ;;  %vm1574_vm14 = vnez %v1506_v39  ;;  %v882_v39 = vld [vmem:[%s1480_s3 + $0x4] sm:$0xf] }
 0x312   : > { %vm1573_vm13 = vmmov %vm1572_vm12 }
 0x315   : > { %v1012_v19 = vpop.permute.xlu2 %1011 }
 0x316   : > { %v1014_v20 = vunpack.i.h.bf16 %v1012_v19  ;;  %v1013_v21 = vunpack.i.l.bf16 %v1012_v19 }
 0x318   : > { %v591_v22 = vsel %vm1568_vm1, %v1013_v21, %v1014_v20  ;;  %v592_v23 = vsel %vm1569_vm6, %v1014_v20, %v1013_v21  ;;  %vm1575_vm1 = vnez %v1508_v40  ;;  %vm1576_vm6 = vnez %v1514_v62  ;;  %v639_v40 = vld [vmem:[%s1480_s3] sm:$0xf]  ;;  %v887_v62 = vld [vmem:[%s1480_s3 + $0x8] sm:$0xf] }
 0x319   : > { %v593_v48 = vsel %vm1576_vm6, %v592_v23, -inf }
 0x324   : > { %v1007_v18 = vpop.permute.xlu1 %1006  ;;  %v1002_v27 = vpop.permute.xlu0 %1001 }
 0x325   : > { %v1009_v28 = vunpack.i.h.bf16 %v1007_v18  ;;  %v1008_v25 = vunpack.i.l.bf16 %v1007_v18  ;;  %v1004_v26 = vunpack.i.h.bf16 %v1002_v27  ;;  %v1003_v29 = vunpack.i.l.bf16 %v1002_v27 }
 0x327   : > { %v583_v32 = vsel %vm1570_vm3, %v1008_v25, %v1009_v28  ;;  %v584_v34 = vsel %vm1571_vm2, %v1009_v28, %v1008_v25  ;;  %v571_v35 = vsel %vm1572_vm12, %v1003_v29, %v1004_v26  ;;  %v572_v46 = vsel %vm1573_vm13, %v1004_v26, %v1003_v29 }
 0x328   : > { %v585_v47 = vsel %vm1551_vm9, %v583_v32, -inf  ;;  %v586_v36 = vsel %vm1552_vm11, %v584_v34, -inf  ;;  %v573_v37 = vsel %vm1574_vm14, %v572_v46, -inf  ;;  %v574_v38 = vsel %vm1575_vm1, %v571_v35, -inf }
 0x329   : > { %v575_v41 = vmax.f32 %v573_v37, %v565_v30  ;;  %v576_v42 = vmax.f32 %v574_v38, %v566_v31  ;;  %vm1577_vm12 = vnez %v1516_v63  ;;  %v595_v50 = vmax.f32 %v593_v48, %v585_v47  ;;  %v800_v63 = vld [vmem:[%s1481_s4] sm:$0xff] }
 0x32a   : > { %v594_v49 = vsel %vm1577_vm12, %v591_v22, -inf  ;;  %vm646_vm9 = vcmask 15360   ;;  %vm1578_vm11 = vcmp.lt.s32.totalorder %v1137_v33, 16  ;;  %vm1580_vm2 = vcmp.lt.s32.totalorder %v1137_v33, 112 }
 0x32b   : > { %v596_v3 = vmax.f32 %v594_v49, %v586_v36  ;;  %v577_v51 = vmax.f32 %v557_v7, %v575_v41  ;;  %v578_v54 = vmax.f32 %v558_v8, %v576_v42  ;;  %883 = vmatmul.msk.bf16.vlgmr.msra.gmra.mxu2 %vm646_vm9, %v882_v39  ;;  %884 = vmatmul.msk.bf16.vlgmr.msra.gmra.mxu3 %vm646_vm9, %v882_v39  ;;  %vm1579_vm3 = vmmov %vm1578_vm11  ;;  %vm1582_vm14 = vcmp.lt.s32.totalorder %v1137_v33, 96 }
 0x32c   : > { %885 = vmatmul.msk.bf16.vlgmr.msrb.gmra.mxu0 %vm646_vm9, %v639_v40  ;;  %886 = vmatmul.msk.bf16.vlgmr.msrb.gmra.mxu1 %vm646_vm9, %v639_v40  ;;  %vm1581_vm13 = vmmov %vm1580_vm2 }
 0x32d   : > { %v597_v4 = vmax.f32 %v577_v51, %v595_v50  ;;  %v598_v57 = vmax.f32 %v578_v54, %v596_v3  ;;  %vm1583_vm1 = vmmov %vm1582_vm14 }
 0x32f   : > { %v1025_v58 = vpack.i.bf16 %v598_v57, %v597_v4 }
 0x331   : > { %1026 = vrot.lane.b32.xlu2 %v1025_v58, %s1049_s17  ;;  %1021 = vrot.lane.b32.xlu1 %v1025_v58, %s1050_s18 }
 0x332   : > { %1016 = vrot.lane.b32.xlu0 %v1025_v58, %s1051_s19 }
 0x339   : > { %803 = vperm.xlu1 %1035, %v800_v63  }
 0x33a   : > { %1031 = vrot.lane.b32.xlu0 %v1025_v58, %s1052_s20 }
 0x33b   : > { %888 = vmatmul.msk.bf16.vlgmr.msrb.gmra.mxu2 %vm646_vm9, %v887_v62  ;;  %889 = vmatmul.msk.bf16.vlgmr.msrb.gmra.mxu3 %vm646_vm9, %v887_v62 }
 0x38b   : > { %v1027_v2 = vpop.permute.xlu2 %1026 }
 0x38c   : > { %v1029_v11 = vunpack.i.h.bf16 %v1027_v2  ;;  %v1028_v12 = vunpack.i.l.bf16 %v1027_v2 }
 0x38e   : > { %v623_v19 = vsel %vm1582_vm14, %v1028_v12, %v1029_v11  ;;  %v624_v20 = vsel %vm1583_vm1, %v1029_v11, %v1028_v12 }
 0x38f   : > { %v625_v44 = vsel %vm1250_vm4, %v623_v19, -inf  ;;  %v626_v27 = vsel %vm1254_vm15, %v624_v20, -inf }
 0x3a3   : > { %v1022_v59 = vpop.permute.xlu1 %1021 }
 0x3a4   : > { %v1024_v60 = vunpack.i.h.bf16 %v1022_v59  ;;  %v1023_v61 = vunpack.i.l.bf16 %v1022_v59  ;;  %v1017_v1 = vpop.permute.xlu0 %1016 }
 0x3a5   : > { %v1019_v5 = vunpack.i.h.bf16 %v1017_v1  ;;  %v1018_v6 = vunpack.i.l.bf16 %v1017_v1 }
 0x3a6   : > { %v611_v7 = vsel %vm1578_vm11, %v1023_v61, %v1024_v60  ;;  %v612_v8 = vsel %vm1579_vm3, %v1024_v60, %v1023_v61 }
 0x3a7   : > { %v603_v9 = vsel %vm1580_vm2, %v1018_v6, %v1019_v5  ;;  %v604_v10 = vsel %vm1581_vm13, %v1019_v5, %v1018_v6  ;;  %v613_v13 = vsel %vm1259_vm0, %v612_v8, -inf  ;;  %v614_v14 = vsel %vm1263_vm5, %v611_v7, -inf }
 0x3a8   : > { %v605_v15 = vsel %vm1559_vm10, %v603_v9, -inf  ;;  %v606_v16 = vsel %vm1232_vm7, %v604_v10, -inf  ;;  %vm1584_vm0 = vcmp.lt.s32.totalorder %v1137_v33, 32  ;;  %vm1586_vm10 = vnez %v1528_v45 }
 0x3a9   : > { %v615_v24 = vmax.f32 %v613_v13, %v605_v15  ;;  %v616_v17 = vmax.f32 %v614_v14, %v606_v16  ;;  %vm1585_vm5 = vmmov %vm1584_vm0  ;;  %vm1587_vm7 = vcmask 1040384   ;;  %v701_v47 = vpop.f32.mrf.mxu0  ;;  %v714_v36 = vpop.f32.mrf.mxu1 }
 0x3aa   : > { %vm1588_vm4 = vmmov %vm1587_vm7 }
 0x3ab   : > { %v617_v30 = vmax.f32 %v597_v4, %v615_v24  ;;  %v618_v31 = vmax.f32 %v598_v57, %v616_v17  ;;  %v804_v4 = vpop.permute.xlu1 %803 }
 0x3ac   : > { %v1032_v21 = vpop.permute.xlu0 %1031 }
 0x3ad   : > { %v1034_v55 = vunpack.i.h.bf16 %v1032_v21  ;;  %v1033_v18 = vunpack.i.l.bf16 %v1032_v21 }
 0x3ae   : > { %v666_v45 = vpop.f32.mrf.mxu2  ;;  %v679_v53 = vpop.f32.mrf.mxu3 }
 0x3af   : > { %v631_v56 = vsel %vm1584_vm0, %v1033_v18, %v1034_v55  ;;  %v632_v43 = vsel %vm1585_vm5, %v1034_v55, %v1033_v18  ;;  %v702_v50 = vadd.f32 %v701_v47, %v666_v45  ;;  %v715_v3 = vadd.f32 %v714_v36, %v679_v53 }
 0x3b0   : > { %v633_v28 = vsel %vm1237_vm8, %v632_v43, -inf  ;;  %v634_v25 = vsel %vm1586_vm10, %v631_v56, -inf }
 0x3b1   : > { %v635_v26 = vmax.f32 %v633_v28, %v625_v44  ;;  %v636_v29 = vmax.f32 %v634_v25, %v626_v27  ;;  %v703_v37 = vpop.f32.mrf.mxu0  ;;  %v716_v38 = vpop.f32.mrf.mxu1 }
 0x3b3   : > { %v637_v22 = vmax.f32 %v617_v30, %v635_v26  ;;  %v638_v23 = vmax.f32 %v618_v31, %v636_v29 }
 0x3b5   : > { %v761_v33 = vpack.c.bf16 %v637_v22, %v637_v22  ;;  %v762_v32 = vpack.c.bf16 %v638_v23, %v638_v23 }
 0x3b6   : > { %v668_v35 = vpop.f32.mrf.mxu2  ;;  %v681_v46 = vpop.f32.mrf.mxu3 }
 0x3b7   : > { %v767_v52 = vsel %vm1587_vm7, %v761_v33, 0  ;;  %v770_v34 = vsel %vm1588_vm4, %v762_v32, 0 }
 0x3b8   : > { %779 = vmatpush.bf16.msra.mxu0 %v767_v52  ;;  %792 = vmatpush.bf16.msra.mxu1 %v770_v34 }
 0x3bb   : > { %891 = vmatmul.msk.bf16.vlgmr.msra.gmra.mxu0 %vm646_vm9, %v890_v0  ;;  %892 = vmatmul.msk.bf16.vlgmr.msra.gmra.mxu1 %vm646_vm9, %v890_v0 }
 0x3be   : > { %v740_v41 = vpop.f32.mrf.mxu2  ;;  %v753_v42 = vpop.f32.mrf.mxu3 }
 0x3bf   : > { %v757_v51 = vadd.f32 %v740_v41, %v702_v50  ;;  %v758_v54 = vadd.f32 %v753_v42, %v715_v3 }
 0x3c6   : > { %v742_v48 = vpop.f32.mrf.mxu2  ;;  %v755_v49 = vpop.f32.mrf.mxu3 }
 0x438   : > { %v781_v57 = vpop.f32.mrf.mxu0  ;;  %v794_v58 = vpop.f32.mrf.mxu1 }
 0x439   : > { %v798_v39 = vadd.f32 %v781_v57, %v757_v51  ;;  %v799_v40 = vadd.f32 %v794_v58, %v758_v54 }
 0x43b   : > { %v806_v62 = vadd.f32 %v804_v4, %v798_v39  ;;  %v807_v63 = vadd.f32 %v804_v4, %v799_v40 }
 0x43d   : > { %vm808_vm15 = vcmp.gt.f32.partialorder %v806_v62, 0.0  ;;  %vm809_vm8 = vcmp.gt.f32.partialorder %v807_v63, 0.0  ;;  %v810_v59 = vmul.f32 0.1, %v806_v62  ;;  %v811_v60 = vmul.f32 0.1, %v807_v63 }
 0x43f   : > { %v812_v61 = vsel %vm808_vm15, %v806_v62, %v810_v59  ;;  %v813_v1 = vsel %vm809_vm8, %v807_v63, %v811_v60 }
 0x440   : > { %814 = vst [vmem:[%s278_s15] sm:$0xff] %v812_v61  ;;  %v783_v2 = vpop.f32.mrf.mxu0  ;;  %v796_v5 = vpop.f32.mrf.mxu1 }
 0x441   : > { %815 = vst [vmem:[%s278_s15 + $0x8] sm:$0xff] %v813_v1 }
 0x442 PF: > { %s17_s24 = sadd.s32 1, %s1042_s24  }
 0x443   : > { %p14_p4 = scmp.ge.s32.totalorder %s17_s24, 4  }
 0x445   :  { %16 = sbr.rel (!%p14_p4) target bundleno = 1 (0x1), region = 81 }

</bundles_post_ra>
